<compile_context>
chip_gen: v7x
topology: tpu7x:2x2x1
jax: 0.10.0
libtpu: 0.0.40
codegen_flags: <defaults>
</compile_context>

<pallas_src>
import functools

import jax
import jax.numpy as jnp
from jax.experimental import pallas as pl
from jax.experimental.pallas import tpu as pltpu


def _round_up(x: int, m: int) -> int:
    return ((x + m - 1) // m) * m


def _skipgram_logprob_kernel(center_ref, target_ref, u_ref, out_ref,
                             m_ref, l_ref, *, v_total, tv):
    # center_ref/target_ref: [tb, E_pad]; u_ref: [tv, E_pad] (one vocab tile)
    # out_ref: [tb, 1] log-probabilities; m_ref/l_ref: [tb, 1] f32 scratch.
    vi = pl.program_id(1)
    nv = pl.num_programs(1)

    @pl.when(vi == 0)
    def _():
        m_ref[...] = jnp.full_like(m_ref, -jnp.inf)
        l_ref[...] = jnp.zeros_like(l_ref)

    center = center_ref[...]                               # [tb, E_pad]
    u_tile = u_ref[...]                                    # [tv, E_pad]

    # MXU: [tb, E] x [tv, E]^T -> [tb, tv] logits, f32 accumulation.
    logits = jax.lax.dot_general(
        center, u_tile,
        dimension_numbers=(((1,), (1,)), ((), ())),
        preferred_element_type=jnp.float32)

    # Mask padded vocab rows (past the real V) so they contribute nothing.
    col = jax.lax.broadcasted_iota(jnp.int32, logits.shape, 1) + vi * tv
    logits = jnp.where(col < v_total, logits, jnp.float32(-1e30))

    # Online (streaming) log-sum-exp over the V axis.
    m_prev = m_ref[...]
    m_new = jnp.maximum(m_prev, jnp.max(logits, axis=-1, keepdims=True))
    l_ref[...] = (l_ref[...] * jnp.exp(m_prev - m_new)
                  + jnp.sum(jnp.exp(logits - m_new), axis=-1, keepdims=True))
    m_ref[...] = m_new

    @pl.when(vi == nv - 1)
    def _():
        # scores[b] = <target[b], center[b]>  (tiny VPU/XLU epilogue)
        scores = jnp.sum(
            target_ref[...].astype(jnp.float32) * center.astype(jnp.float32),
            axis=-1, keepdims=True)                        # [tb, 1]
        out_ref[...] = scores - (m_ref[...] + jnp.log(l_ref[...]))


def skipgram_forward(emb_v, emb_u, center_words, target_words, all_vocabs):
    """center_words, target_words: int32 [B, 1]; all_vocabs: int32 [B, V]."""
    B = center_words.shape[0]
    V = all_vocabs.shape[1]
    E = emb_v.shape[1]

    # Embedding lookups for center/target (tiny [B] gathers, plain JAX glue).
    center_embeds = jnp.take(emb_v, center_words[:, 0], axis=0)   # [B, E]
    target_embeds = jnp.take(emb_u, target_words[:, 0], axis=0)   # [B, E]

    # all_vocabs lists the full vocab per row (standard Skipgram full
    # softmax), so gather the [V, E] table ONCE instead of a [B, V, E] copy.
    # TODO(synk): per-row negative-sampling indices would need a
    # PrefetchScalarGridSpec / DMA gather instead of this shared table.
    u_table = jnp.take(emb_u, all_vocabs[0], axis=0)              # [V, E]

    # --- Tile / padding selection (all (8,128) aligned, lane-dense) ---
    e_pad = _round_up(E, 128)                 # lane-dense contraction dim
    tb = min(_round_up(B, 8), 128)            # sublane-aligned batch tile
    b_pad = _round_up(B, tb)

    # Vocab tile: multiple of 128 rows, sized so the double-buffered emb_u
    # stream stays around ~4 MiB per buffer (safe on v5e/v6e/v7x defaults).
    bytes_per_row = e_pad * 4
    tv_budget = max(128, ((4 * 1024 * 1024) // bytes_per_row) // 128 * 128)
    tv = min(_round_up(V, 128), tv_budget, 2048)
    v_pad = _round_up(V, tv)

    center_p = jnp.pad(center_embeds, ((0, b_pad - B), (0, e_pad - E)))
    target_p = jnp.pad(target_embeds, ((0, b_pad - B), (0, e_pad - E)))
    u_p = jnp.pad(u_table, ((0, v_pad - V), (0, e_pad - E)))

    grid = (b_pad // tb, v_pad // tv)

    kernel = functools.partial(_skipgram_logprob_kernel, v_total=V, tv=tv)

    log_prob = pl.pallas_call(
        kernel,
        out_shape=jax.ShapeDtypeStruct((b_pad, 1), jnp.float32),
        grid_spec=pltpu.PrefetchScalarGridSpec(
            num_scalar_prefetch=0,
            grid=grid,
            in_specs=[
                pl.BlockSpec((tb, e_pad), lambda bi, vi: (bi, 0)),   # center
                pl.BlockSpec((tb, e_pad), lambda bi, vi: (bi, 0)),   # target
                pl.BlockSpec((tv, e_pad), lambda bi, vi: (vi, 0)),   # emb_u tile
            ],
            out_specs=pl.BlockSpec((tb, 1), lambda bi, vi: (bi, 0)),
            scratch_shapes=[
                pltpu.VMEM((tb, 1), jnp.float32),   # running max m
                pltpu.VMEM((tb, 1), jnp.float32),   # running sum l
            ],
        ),
        compiler_params=pltpu.CompilerParams(
            dimension_semantics=("parallel", "arbitrary"),
            vmem_limit_bytes=32 * 1024 * 1024,
        ),
    )(center_p, target_p, u_p)

    # Final scalar reduction over B (negligible) in plain JAX.
    return -jnp.mean(log_prob[:B, 0])


if __name__ == "__main__":
    VOCAB = 8     # vocab_size
    EMB = 32      # emb_size
    B = 2         # batch

    key = jax.random.PRNGKey(0)
    k_v, k_u, k_c, k_t = jax.random.split(key, 4)

    # Deterministic parameter init (nn.Embedding weights ~ N(0, 1)).
    emb_v = jax.random.normal(k_v, (VOCAB, EMB), dtype=jnp.float32)
    emb_u = jax.random.normal(k_u, (VOCAB, EMB), dtype=jnp.float32)

    # Inputs: center/target word indices [B, 1], all-vocab indices [B, V].
    center_words = jax.random.randint(k_c, (B, 1), 0, VOCAB, dtype=jnp.int32)
    target_words = jax.random.randint(k_t, (B, 1), 0, VOCAB, dtype=jnp.int32)
    all_vocabs = jnp.broadcast_to(
        jnp.arange(VOCAB, dtype=jnp.int32)[None, :], (B, VOCAB)
    )

    nll = skipgram_forward(emb_v, emb_u, center_words, target_words, all_vocabs)
    nll = jax.block_until_ready(nll)

    # Pure-JAX reference check (original, unstabilized formula).
    c = jnp.take(emb_v, center_words[:, 0], axis=0)
    t = jnp.take(emb_u, target_words[:, 0], axis=0)
    a = jnp.take(emb_u, all_vocabs, axis=0)
    scores_ref = jnp.sum(t * c, axis=-1)
    norm_ref = jnp.einsum("bve,be->bv", a, c)
    nll_ref = -jnp.mean(
        jnp.log(jnp.exp(scores_ref) / jnp.sum(jnp.exp(norm_ref), axis=-1))
    )
    assert jnp.allclose(nll, nll_ref, rtol=1e-5, atol=1e-5), (nll, nll_ref)

    print("KERNEL_OK")
</pallas_src>

<mosaic_0001>
module attributes {stable_mosaic.version = 11 : i64} {
  func.func @_skipgram_logprob_kernel(%arg0: i32, %arg1: i32, %arg2: memref<8x128xf32, #tpu.memory_space<vmem>>, %arg3: memref<8x128xf32, #tpu.memory_space<vmem>>, %arg4: memref<128x128xf32, #tpu.memory_space<vmem>>, %arg5: memref<8x1xf32, #tpu.memory_space<vmem>>, %arg6: memref<8x1xf32, #tpu.memory_space<vmem>>, %arg7: memref<8x1xf32, #tpu.memory_space<vmem>>) attributes {dimension_semantics = [#tpu.dimension_semantics<parallel>, #tpu.dimension_semantics<arbitrary>], iteration_bounds = array<i64: 1, 1>, scalar_prefetch = 0 : i64, scratch_operands = 2 : i64, tpu.core_type = #tpu.core_type<tc>, window_params = [{transform_indices = @transform_0, window_bounds = array<i64: 8, 128>}, {transform_indices = @transform_1, window_bounds = array<i64: 8, 128>}, {transform_indices = @transform_2, window_bounds = array<i64: 128, 128>}, {transform_indices = @transform_3, window_bounds = array<i64: 8, 1>}]} {
    %c0_i32 = arith.constant 0 : i32
    %0 = arith.cmpi eq, %arg1, %c0_i32 : i32
    %1 = arith.extui %0 : i1 to i32
    %c0_i32_0 = arith.constant 0 : i32
    %2 = arith.cmpi ne, %1, %c0_i32_0 : i32
    scf.if %2 {
      %cst_17 = arith.constant 0xFF800000 : f32
      %33 = vector.broadcast %cst_17 : f32 to vector<8x1xf32>
      %c0_18 = arith.constant 0 : index
      %c0_19 = arith.constant 0 : index
      %34 = vector.load %arg6[%c0_18, %c0_19] : memref<8x1xf32, #tpu.memory_space<vmem>>, vector<8x1xf32>
      tpu.vector_store %arg6[%c0_18, %c0_19], %33 {strides = array<i32>} : memref<8x1xf32, #tpu.memory_space<vmem>>, vector<8x1xf32>,
      %cst_20 = arith.constant 0.000000e+00 : f32
      %35 = vector.broadcast %cst_20 : f32 to vector<8x1xf32>
      %c0_21 = arith.constant 0 : index
      %c0_22 = arith.constant 0 : index
      %36 = vector.load %arg7[%c0_21, %c0_22] : memref<8x1xf32, #tpu.memory_space<vmem>>, vector<8x1xf32>
      tpu.vector_store %arg7[%c0_21, %c0_22], %35 {strides = array<i32>} : memref<8x1xf32, #tpu.memory_space<vmem>>, vector<8x1xf32>,
    } else {
    }
    %c0 = arith.constant 0 : index
    %c0_1 = arith.constant 0 : index
    %3 = vector.load %arg2[%c0, %c0_1] : memref<8x128xf32, #tpu.memory_space<vmem>>, vector<8x128xf32>
    %c0_2 = arith.constant 0 : index
    %c0_3 = arith.constant 0 : index
    %4 = vector.load %arg4[%c0_2, %c0_3] : memref<128x128xf32, #tpu.memory_space<vmem>>, vector<128x128xf32>
    %cst = arith.constant dense<0.000000e+00> : vector<8x128xf32>
    %5 = tpu.matmul %3, %4, %cst {dimension_numbers = #tpu.dot_dimension_numbers<[1], [1], [0], [0], [0, 0, 1, 0], [], []>} : vector<8x128xf32>, vector<128x128xf32>, vector<8x128xf32> -> vector<8x128xf32>
    %6 = tpu.iota {dimensions = array<i32: 1>} : vector<8x128xi32>
    %c128_i32 = arith.constant 128 : i32
    %7 = arith.muli %arg1, %c128_i32 : i32
    %8 = vector.broadcast %7 : i32 to vector<8x128xi32>
    %9 = arith.addi %6, %8 : vector<8x128xi32>
    %c8_i32 = arith.constant 8 : i32
    %10 = vector.broadcast %c8_i32 : i32 to vector<8x128xi32>
    %11 = arith.cmpi slt, %9, %10 : vector<8x128xi32>
    %cst_4 = arith.constant -1.000000e+30 : f32
    %12 = vector.broadcast %cst_4 : f32 to vector<8x128xf32>
    %13 = arith.select %11, %5, %12 : vector<8x128xi1>, vector<8x128xf32>
    %c0_5 = arith.constant 0 : index
    %c0_6 = arith.constant 0 : index
    %14 = vector.load %arg6[%c0_5, %c0_6] : memref<8x1xf32, #tpu.memory_space<vmem>>, vector<8x1xf32>
    %cst_7 = arith.constant dense<0xFF800000> : vector<8xf32>
    %15 = vector.multi_reduction <maximumf>, %13, %cst_7 [1] : vector<8x128xf32> to vector<8xf32>
    %16 = vector.shape_cast %15 : vector<8xf32> to vector<8x1xf32>
    %17 = arith.maximumf %14, %16 : vector<8x1xf32>
    %c0_8 = arith.constant 0 : index
    %c0_9 = arith.constant 0 : index
    %18 = vector.load %arg7[%c0_8, %c0_9] : memref<8x1xf32, #tpu.memory_space<vmem>>, vector<8x1xf32>
    %19 = arith.subf %14, %17 : vector<8x1xf32>
    %20 = math.exp %19 : vector<8x1xf32>
    %21 = arith.mulf %18, %20 : vector<8x1xf32>
    %22 = vector.broadcast %17 : vector<8x1xf32> to vector<8x128xf32>
    %23 = arith.subf %13, %22 : vector<8x128xf32>
    %24 = math.exp %23 : vector<8x128xf32>
    %cst_10 = arith.constant dense<0.000000e+00> : vector<8xf32>
    %25 = vector.multi_reduction <add>, %24, %cst_10 [1] : vector<8x128xf32> to vector<8xf32>
    %26 = vector.shape_cast %25 : vector<8xf32> to vector<8x1xf32>
    %27 = arith.addf %21, %26 : vector<8x1xf32>
    %c0_11 = arith.constant 0 : index
    %c0_12 = arith.constant 0 : index
    %28 = vector.load %arg7[%c0_11, %c0_12] : memref<8x1xf32, #tpu.memory_space<vmem>>, vector<8x1xf32>
    tpu.vector_store %arg7[%c0_11, %c0_12], %27 {strides = array<i32>} : memref<8x1xf32, #tpu.memory_space<vmem>>, vector<8x1xf32>,
    %c0_13 = arith.constant 0 : index
    %c0_14 = arith.constant 0 : index
    %29 = vector.load %arg6[%c0_13, %c0_14] : memref<8x1xf32, #tpu.memory_space<vmem>>, vector<8x1xf32>
    tpu.vector_store %arg6[%c0_13, %c0_14], %17 {strides = array<i32>} : memref<8x1xf32, #tpu.memory_space<vmem>>, vector<8x1xf32>,
    %c0_i32_15 = arith.constant 0 : i32
    %30 = arith.cmpi eq, %arg1, %c0_i32_15 : i32
    %31 = arith.extui %30 : i1 to i32
    %c0_i32_16 = arith.constant 0 : i32
    %32 = arith.cmpi ne, %31, %c0_i32_16 : i32
    scf.if %32 {
      %c0_17 = arith.constant 0 : index
      %c0_18 = arith.constant 0 : index
      %33 = vector.load %arg3[%c0_17, %c0_18] : memref<8x128xf32, #tpu.memory_space<vmem>>, vector<8x128xf32>
      %34 = arith.mulf %33, %3 : vector<8x128xf32>
      %cst_19 = arith.constant dense<0.000000e+00> : vector<8xf32>
      %35 = vector.multi_reduction <add>, %34, %cst_19 [1] : vector<8x128xf32> to vector<8xf32>
      %36 = vector.shape_cast %35 : vector<8xf32> to vector<8x1xf32>
      %c0_20 = arith.constant 0 : index
      %c0_21 = arith.constant 0 : index
      %37 = vector.load %arg6[%c0_20, %c0_21] : memref<8x1xf32, #tpu.memory_space<vmem>>, vector<8x1xf32>
      %c0_22 = arith.constant 0 : index
      %c0_23 = arith.constant 0 : index
      %38 = vector.load %arg7[%c0_22, %c0_23] : memref<8x1xf32, #tpu.memory_space<vmem>>, vector<8x1xf32>
      %39 = math.log %38 : vector<8x1xf32>
      %40 = arith.addf %37, %39 : vector<8x1xf32>
      %41 = arith.subf %36, %40 : vector<8x1xf32>
      %c0_24 = arith.constant 0 : index
      %c0_25 = arith.constant 0 : index
      %42 = vector.load %arg5[%c0_24, %c0_25] : memref<8x1xf32, #tpu.memory_space<vmem>>, vector<8x1xf32>
      tpu.vector_store %arg5[%c0_24, %c0_25], %41 {strides = array<i32>} : memref<8x1xf32, #tpu.memory_space<vmem>>, vector<8x1xf32>,
    } else {
    }
    return
  }
  func.func @transform_0(%arg0: i32, %arg1: i32) -> (i32, i32) {
    %c0_i32 = arith.constant 0 : i32
    %c0_i32_0 = arith.constant 0 : i32
    return %arg0, %c0_i32 : i32, i32
  }
  func.func @transform_1(%arg0: i32, %arg1: i32) -> (i32, i32) {
    %c0_i32 = arith.constant 0 : i32
    %c0_i32_0 = arith.constant 0 : i32
    return %arg0, %c0_i32 : i32, i32
  }
  func.func @transform_2(%arg0: i32, %arg1: i32) -> (i32, i32) {
    %c0_i32 = arith.constant 0 : i32
    %c0_i32_0 = arith.constant 0 : i32
    return %arg1, %c0_i32 : i32, i32
  }
  func.func @transform_3(%arg0: i32, %arg1: i32) -> (i32, i32) {
    %c0_i32 = arith.constant 0 : i32
    %c0_i32_0 = arith.constant 0 : i32
    return %arg0, %c0_i32 : i32, i32
  }
}

</mosaic_0001>

<bundles_post_ra>
// kernel: tpu_custom_call.1
= control target key start
LH: loop header
LB: loop body
LE: loop exit
PB: predicated region body
PF: predicated region fallthrough
CT: control target
= control target key end

     0   :  { %8 = vsyncpa [#allocation5], 0  ;;  %s432_s0 = inlined_call_operand.hbm [shape: f32[8,128], index: 0, kind: input, shape index: {}]   ;;  %s433_s1 = inlined_call_operand.hbm [shape: f32[8,128], index: 1, kind: input, shape index: {}]   ;;  %s434_s2 = inlined_call_operand.hbm [shape: f32[128,128], index: 2, kind: input, shape index: {}]   ;;  %s435_s3 = inlined_call_operand.vmem [shape: f32[8,1], index: 3, kind: output, shape index: {}]  }
   0x1   :  { %9 = vsyncpa [#allocation7], 0  ;;  %s358_s12 = smov [#allocation6]   ;;  %s359_s14 = smov [#allocation4]  }
   0x2   :  { %s26_s13 = sshll.u32 %s358_s12, 4  ;;  %s16_s15 = sshll.u32 %s359_s14, 4  ;;  %s27_s13 = int_to_ptr.vmem [resolvable:$true] %s26_s13  ;;  %s17_s15 = int_to_ptr.vmem [resolvable:$true] %s16_s15 }
   0x3   :  { %s288_s18 = scalar_lea.hbm %s433_s1, 128 }
   0x4   :  { %p289_p0 = scmp.ne.s32.totalorder %s433_s1, %s288_s18  ;;  %p292_p1 = scmp.lt.u32.totalorder %s288_s18, %s433_s1 }
   0x6   :  { %p294_p2 = pnand %p292_p1, %p289_p0 }
   0x8   :  { %297 = shalt.err (!%p294_p2)
}
   0x9   :  { %s298_s23 = scalar_lea.vmem %s27_s13, 128  ;;  %p303_p4 = scmp.lt.s32.totalorder %s27_s13, %s27_s13 }
   0xa   :  { %p299_p3 = scmp.ne.s32.totalorder %s27_s13, %s298_s23  ;;  %p304_p5 = scmp.lt.s32.totalorder %s298_s23, %s298_s23 }
   0xc   :  { %p305_p6 = por %p304_p5, %p303_p4 }
   0xe   :  { %p306_p7 = pnand %p305_p6, %p299_p3 }
  0x10   :  { %309 = shalt.err (!%p306_p7)
}
  0x11   :  { %29 = dma.hbm_to_vmem [thread:$0]  %s433_s1, 128, %s27_s13, [#allocation7]  }
  0x12   :  { %s310_s28 = scalar_lea.hbm %s432_s0, 128 }
  0x13   :  { %p311_p8 = scmp.ne.s32.totalorder %s432_s0, %s310_s28  ;;  %p314_p9 = scmp.lt.u32.totalorder %s310_s28, %s432_s0 }
  0x15   :  { %p316_p10 = pnand %p314_p9, %p311_p8 }
  0x17   :  { %319 = shalt.err (!%p316_p10)
}
  0x18   :  { %s320_s6 = scalar_lea.vmem %s17_s15, 128  ;;  %p325_p12 = scmp.lt.s32.totalorder %s17_s15, %s17_s15 }
  0x19   :  { %p321_p11 = scmp.ne.s32.totalorder %s17_s15, %s320_s6  ;;  %p326_p13 = scmp.lt.s32.totalorder %s320_s6, %s320_s6 }
  0x1b   :  { %p327_p0 = por %p326_p13, %p325_p12 }
  0x1d   :  { %p328_p1 = pnand %p327_p0, %p321_p11 }
  0x1f   :  { %331 = shalt.err (!%p328_p1)
}
  0x20   :  { %19 = dma.hbm_to_vmem [thread:$0]  %s432_s0, 128, %s17_s15, [#allocation5]  }
  0x21   :  { %s360_s8 = smov [#allocation8]   ;;  %s332_s12 = scalar_lea.hbm %s434_s2, 2048 }
  0x22   :  { %s35_s9 = sshll.u32 %s360_s8, 4  ;;  %p333_p2 = scmp.ne.s32.totalorder %s434_s2, %s332_s12  ;;  %s36_s9 = int_to_ptr.vmem [resolvable:$true] %s35_s9 }
  0x23   :  { %p336_p3 = scmp.lt.u32.totalorder %s332_s12, %s434_s2 }
  0x25   :  { %p338_p4 = pnand %p336_p3, %p333_p2 }
  0x27   :  { %341 = shalt.err (!%p338_p4)
}
  0x28   :  { %s342_s18 = scalar_lea.vmem %s36_s9, 2048  ;;  %p347_p6 = scmp.lt.s32.totalorder %s36_s9, %s36_s9 }
  0x29   :  { %p343_p5 = scmp.ne.s32.totalorder %s36_s9, %s342_s18  ;;  %p348_p7 = scmp.lt.s32.totalorder %s342_s18, %s342_s18 }
  0x2b   :  { %p349_p8 = por %p348_p7, %p347_p6 }
  0x2d   :  { %p350_p9 = pnand %p349_p8, %p343_p5 }
  0x2f   :  { %353 = shalt.err (!%p350_p9)
}
  0x30   :  { %s361_s0 = smov 128   ;;  %s362_s15 = smov 8  }
  0x31   :  { %41 = dma.hbm_to_vmem [thread:$0]  %s434_s2, 2048, %s36_s9, [#allocation7], %s361_s0, %s361_s0, %s362_s15  }
  0x32   :  { %354 = dma.done.wait [#allocation5], 128  }
  0x33   :  { %355 = vsyncadd [#allocation5], 4294967168 }
  0x34   :  { %356 = dma.done.wait [#allocation7], 2176  }
  0x35   :  { %357 = vsyncadd [#allocation7], 4294965120  ;;  %vm55_vm0 = vcmask 7168   ;;  %v363_v0 = vmov 0.0|0.0   ;;  %v364_v1 = vmov 0.0   ;;  %vm365_vm1 = vmmov 0  }
  0x36   :  { %247 = vmatprep.subr.bf16.mxu0 %v363_v0  ;;  %57 = vst.msk [vmem:[#allocation3] sm:$0xff] %vm55_vm0, %v364_v1  ;;  %244 = vmatprep.mubr.msk.f32.mxu0 %vm365_vm1, %v364_v1  ;;  %v59_v2 = vld [vmem:[#allocation8] sm:$0xff]  ;;  %v60_v3 = vld [vmem:[#allocation8 + $0x8] sm:$0xff]  ;;  %v61_v5 = vld [vmem:[#allocation8 + $0x10] sm:$0xff]  ;;  %v366_v27 = vmov -inf   ;;  %v145_v28 = vlaneseq  ;;  %v367_v33 = vmov 0  }
  0x37   :  { %v248_v4 = vpack.c.bf16 %v60_v3, %v59_v2  ;;  %v62_v6 = vld [vmem:[#allocation8 + $0x18] sm:$0xff]  ;;  %v63_v8 = vld [vmem:[#allocation8 + $0x20] sm:$0xff]  ;;  %v64_v9 = vld [vmem:[#allocation8 + $0x28] sm:$0xff]  ;;  %56 = vst.msk [vmem:[#allocation2] sm:$0xff] %vm55_vm0, %v366_v27  ;;  %281 = vset.pattern.permute.xlu0 %v367_v33 }
  0x38   :  { %v251_v7 = vpack.c.bf16 %v62_v6, %v61_v5  ;;  %v254_v10 = vpack.c.bf16 %v64_v9, %v63_v8  ;;  %v65_v11 = vld [vmem:[#allocation8 + $0x30] sm:$0xff]  ;;  %v66_v12 = vld [vmem:[#allocation8 + $0x38] sm:$0xff]  ;;  %v67_v14 = vld [vmem:[#allocation8 + $0x40] sm:$0xff]  ;;  %v146_v29 = vand.u32 127, %v145_v28 }
  0x39   :  { %249 = vmatpush3.bf16.xpose.msra.mxu0 %v248_v4  ;;  %v257_v13 = vpack.c.bf16 %v66_v12, %v65_v11  ;;  %v68_v15 = vld [vmem:[#allocation8 + $0x48] sm:$0xff]  ;;  %v69_v17 = vld [vmem:[#allocation8 + $0x50] sm:$0xff]  ;;  %v70_v18 = vld [vmem:[#allocation8 + $0x58] sm:$0xff] }
  0x3a   :  { %250 = vmatprep.subr.bf16.mxu0 %v363_v0  ;;  %v260_v16 = vpack.c.bf16 %v68_v15, %v67_v14  ;;  %v263_v19 = vpack.c.bf16 %v70_v18, %v69_v17  ;;  %v71_v20 = vld [vmem:[#allocation8 + $0x60] sm:$0xff]  ;;  %v72_v21 = vld [vmem:[#allocation8 + $0x68] sm:$0xff]  ;;  %v73_v23 = vld [vmem:[#allocation8 + $0x70] sm:$0xff]  ;;  %vm150_vm2 = vcmp.lt.s32.totalorder %v146_v29, 8 }
  0x3b   :  { %v266_v22 = vpack.c.bf16 %v72_v21, %v71_v20  ;;  %v74_v24 = vld [vmem:[#allocation8 + $0x78] sm:$0xff]  ;;  %v58_v26 = vld [vmem:[#allocation4] sm:$0xff] }
  0x3c   :  { %v269_v25 = vpack.c.bf16 %v74_v24, %v73_v23  ;;  %v178_v41 = vld [vmem:[#allocation6] sm:$0xff] }
  0x3d   :  { %v179_v43 = vmul.f32 %v178_v41, %v58_v26  ;;  %v156_v46 = vld [vmem:[#allocation3] sm:$0xff] }
  0x3e   :  { %v152_v34 = vld [vmem:[#allocation2] sm:$0xff] }
  0x41   :  { %252 = vmatpush3.bf16.xpose.msra.mxu0 %v251_v7 }
  0x42   :  { %253 = vmatprep.subr.bf16.mxu0 %v363_v0 }
  0x49   :  { %255 = vmatpush3.bf16.xpose.msra.mxu0 %v254_v10 }
  0x4a   :  { %256 = vmatprep.subr.bf16.mxu0 %v363_v0 }
  0x51   :  { %258 = vmatpush3.bf16.xpose.msra.mxu0 %v257_v13 }
  0x52   :  { %259 = vmatprep.subr.bf16.mxu0 %v363_v0 }
  0x59   :  { %261 = vmatpush3.bf16.xpose.msra.mxu0 %v260_v16 }
  0x5a   :  { %262 = vmatprep.subr.bf16.mxu0 %v363_v0 }
  0x61   :  { %264 = vmatpush3.bf16.xpose.msra.mxu0 %v263_v19 }
  0x62   :  { %265 = vmatprep.subr.bf16.mxu0 %v363_v0 }
  0x69   :  { %267 = vmatpush3.bf16.xpose.msra.mxu0 %v266_v22 }
  0x6a   :  { %268 = vmatprep.subr.bf16.mxu0 %v363_v0 }
  0x71   :  { %270 = vmatpush3.bf16.xpose.msra.mxu0 %v269_v25 }
  0x78   :  { %245 = vmatmul.mubr.f32.vlgmr.msra.gmra.mrb[0].mxu0 %v58_v26 }
 0x14b   :  { %v141_v30 = vpop.f32.mrb[0].mxu0 }
 0x14c   :  { %v246_v31 = vpop.f32.mrb[1].mxu0  ;;  %v151_v32 = vsel %vm150_vm2, %v141_v30, -1e+30 }
 0x14d   :  { %153 = vmax.xlane.f32.xlu0 %v151_v32 }
 0x1da   :  { %v154_v35 = vpop.xlane.xlu0 %153 }
 0x1db   :  { %v155_v36 = vmax.f32 %v152_v34, %v154_v35 }
 0x1dd   :  { %v157_v37 = vsub.f32 %v152_v34, %v155_v36  ;;  %174 = vst.msk [vmem:[#allocation2] sm:$0xff] %vm55_vm0, %v155_v36  ;;  %163 = vperm.xlu0 %281, %v155_v36  }
 0x1df   :  { %v158_v44 = vmul.f32 1.442695, %v157_v37 }
 0x1e4   :  { %v182_v54 = vld [vmem:[#allocation2] sm:$0xff] }
 0x25c   :  { %v164_v38 = vpop.permute.xlu0 %163 }
 0x25d   :  { %v166_v39 = vsub.f32 %v151_v32, %v164_v38 }
 0x25f   :  { %v167_v40 = vmul.f32 1.442695, %v166_v39 }
 0x261   :  { %282 = vpow2.f32 %v167_v40 }
 0x262   :  { %284 = vpow2.f32 %v158_v44 }
 0x26b   :  { %v283_v42 = vpop.eup %282 }
 0x26c   :  { %169 = vadd.xlane.f32.xlu1 %v283_v42  ;;  %v285_v45 = vpop.eup %284 }
 0x26d   :  { %v160_v47 = vmul.f32 %v285_v45, %v156_v46 }
 0x270   :  { %180 = vadd.xlane.f32.xlu1 %v179_v43 }
 0x2f9   :  { %v170_v48 = vpop.xlane.xlu1 %169 }
 0x2fa   :  { %v171_v49 = vadd.f32 %v170_v48, %v160_v47 }
 0x2fc   :  { %173 = vst.msk [vmem:[#allocation3] sm:$0xff] %vm55_vm0, %v171_v49 }
 0x2fd   :  { %v181_v53 = vpop.xlane.xlu1 %180 }
 0x303   :  { %v183_v50 = vld [vmem:[#allocation3] sm:$0xff] }
 0x304   :  { %286 = vlog2.f32 %v183_v50 }
 0x30e   :  { %v287_v51 = vpop.eup %286 }
 0x30f   :  { %v185_v52 = vmul.f32 0.6931472, %v287_v51 }
 0x311   :  { %v186_v55 = vadd.f32 %v185_v52, %v182_v54 }
 0x313   :  { %v187_v56 = vsub.f32 %v181_v53, %v186_v55 }
 0x315   :  { %188 = vst.msk [vmem:[%s435_s3] sm:$0xff] %vm55_vm0, %v187_v56 }
 0x316   :  { %193 = vsyncpa [#allocation5], 1 }
 0x317   :  { %194 = vsyncpa [#allocation7], 1 }

</bundles_post_ra>
